<compile_context>
chip_gen: v6e
topology: v6e:2x2x1
jax: 0.10.0
libtpu: 0.0.40
codegen_flags: <defaults>
</compile_context>

<pallas_src>
import functools

import jax
import jax.numpy as jnp
from jax.experimental import pallas as pl
from jax.experimental.pallas import tpu as pltpu


def _round_up(v, m):
    return (v + m - 1) // m * m


def _tree_combine(vals, op):
    vals = list(vals)
    while len(vals) > 1:
        nxt = [op(vals[i], vals[i + 1]) for i in range(0, len(vals) - 1, 2)]
        if len(vals) % 2:
            nxt.append(vals[-1])
        vals = nxt
    return vals[0]


# ---------------------------------------------------------------------------
# Kernel 1: channel reduction on lane-dense (N, C, H*W) blocks.
# ---------------------------------------------------------------------------
def _reduce_kernel(x_ref, red_ref, *, C, NRED):
    nred = min(NRED, C)
    # Split accumulator chains (review item): break the serial C-length
    # add/max dependence so the 4 VALU slots stay fed for large C.
    sums = [x_ref[:, c, :].astype(jnp.float32) for c in range(nred)]
    maxs = [x_ref[:, c, :] for c in range(nred)]
    for c in range(nred, C):
        xc = x_ref[:, c, :]
        j = c % nred
        sums[j] = sums[j] + xc.astype(jnp.float32)
        maxs[j] = jnp.maximum(maxs[j], xc)
    red_sum = _tree_combine(sums, lambda a, b: a + b)      # 1/C folded into w
    red_max = _tree_combine(maxs, jnp.maximum)
    red_ref[:, 0, :] = red_sum
    red_ref[:, 1, :] = red_max.astype(jnp.float32)


# ---------------------------------------------------------------------------
# Kernel 2: lane-packed KxK conv (2 in-channels -> 1) + sigmoid.
# ---------------------------------------------------------------------------
def _conv_kernel(w_ref, r_ref, o_ref, shifted_ref, *,
                 NB, H, W, K, P, Hs, Ws, SLOT, PPR, NGRP, NACC):
    f32 = jnp.float32

    # Hoist the 2*K*K grid-invariant SMEM scalar weight reads out of all loops.
    wv = [w_ref[i] for i in range(2 * K * K)]

    for g in range(NGRP):
        n_slot = min(PPR, NB - g * PPR)

        # ---- pack up to PPR batches side-by-side along lanes, then store the
        # ---- K lane-pre-shifted copies.  The padding rows/columns travel
        # ---- inside the stored block, so the scratch carries no state across
        # ---- grid steps (megacore-safe with "parallel" batch axis).
        for c in range(2):
            padded = jnp.zeros((Hs, Ws), f32)
            for s in range(n_slot):
                b = g * PPR + s
                padded = jax.lax.dynamic_update_slice(
                    padded, r_ref[b, c].astype(f32), (P, s * SLOT + P))
            for kx in range(K):
                if kx == 0:
                    shifted_ref[0, c] = padded
                else:
                    # result[:, j] == padded[:, j + kx]; wraparound lands in
                    # lanes >= PPR*SLOT, which the conv never reads.
                    shifted_ref[kx, c] = pltpu.roll(padded, Ws - kx, axis=1)

        # ---- 2*K*K-tap conv on full 128-lane rows.  ky is a free sublane
        # ---- offset read; kx comes from the pre-shifted copies.  Four split
        # ---- accumulators keep the VALU slots packed (no f32 FMA).
        parts = [jnp.zeros((H, Ws), f32) for _ in range(NACC)]
        t = 0
        for c in range(2):
            for ky in range(K):
                for kx in range(K):
                    strip = shifted_ref[kx, c, ky:ky + H, :]
                    parts[t % NACC] = (parts[t % NACC]
                                       + wv[(c * K + ky) * K + kx] * strip)
                    t += 1
        acc = _tree_combine(parts, lambda a, b: a + b)
        sig = jax.nn.sigmoid(acc)

        # ---- per-batch (H, W) extraction + store ---------------------------
        for s in range(n_slot):
            b = g * PPR + s
            o_ref[b, 0, :, :] = sig[:, s * SLOT:s * SLOT + W].astype(o_ref.dtype)


# ---------------------------------------------------------------------------
# Wrapper
# ---------------------------------------------------------------------------
def _pick_block(n, bytes_fn, budget, max_block=None):
    feas = [d for d in range(1, n + 1)
            if n % d == 0 and bytes_fn(d) <= budget
            and (max_block is None or d <= max_block)]
    if not feas:
        feas = [1]
    # Prefer >= 2 grid steps so both TensorCores get work on multi-core chips,
    # then the largest block (bigger DMAs, fewer per-step overheads).
    pref = [d for d in feas if n // d >= 2]
    return max(pref) if pref else max(feas)


def spatial_attention(x, conv_weight):
    """CBAM SpatialAttention: x (N, C, H, W), conv_weight (1, 2, K, K) -> (N, 1, H, W)."""
    N, C, H, W = x.shape
    out_ch, in_ch, K, K2 = conv_weight.shape
    assert out_ch == 1 and in_ch == 2 and K == K2 and K % 2 == 1
    P = K // 2
    HW = H * W

    # mean over C == sum over C with 1/C folded into the channel-0 weights.
    w = conv_weight.astype(jnp.float32) * jnp.array(
        [1.0 / C, 1.0], jnp.float32).reshape(1, 2, 1, 1)
    w_flat = w.reshape(-1)

    # Generation-aware VMEM budget (v7x has only 64 MiB physical VMEM).
    try:
        vmem_cap = int(pltpu.get_tpu_info().vmem_capacity_bytes)
    except Exception:  # pragma: no cover - conservative fallback
        vmem_cap = 64 * 1024 * 1024
    budget = min(vmem_cap // 2, 48 * 1024 * 1024)

    def _vmem_limit(bytes_needed):
        lim = max(bytes_needed + (16 << 20), 32 << 20)
        return int(min(lim, vmem_cap * 3 // 4))

    # ---- pass 1: channel reduction on lane-dense (N, C, H*W) ---------------
    hw_pad = _round_up(HW, 128)
    c_pad = _round_up(C, 8)

    def _red_bytes(nb):
        in_b = nb * c_pad * hw_pad * x.dtype.itemsize
        out_b = nb * 8 * hw_pad * 4
        return 2 * (in_b + out_b)          # double-buffered in + out

    nb_red = _pick_block(N, _red_bytes, budget)

    red = pl.pallas_call(
        functools.partial(_reduce_kernel, C=C, NRED=4),
        out_shape=jax.ShapeDtypeStruct((N, 2, HW), jnp.float32),
        grid=(N // nb_red,),
        in_specs=[pl.BlockSpec((nb_red, C, HW), lambda i: (i, 0, 0))],
        out_specs=pl.BlockSpec((nb_red, 2, HW), lambda i: (i, 0, 0)),
        compiler_params=pltpu.CompilerParams(
            dimension_semantics=("parallel",),
            vmem_limit_bytes=_vmem_limit(_red_bytes(nb_red))),
    )(x.reshape(N, C, HW))

    # ---- pass 2: packed conv + sigmoid --------------------------------------
    SLOT = W + 2 * P                                   # per-plane lane slot
    PPR = max(1, (128 - 2 * P) // SLOT)                # planes packed per row
    Ws = _round_up(PPR * SLOT + 2 * P, 128)            # lane-aligned row width
    Hs = _round_up(H + 2 * P, 8)                       # sublane-aligned height

    h_pad = _round_up(H, 8)
    w_pad = _round_up(W, 128)
    scratch_bytes = K * 2 * Hs * Ws * 4

    def _conv_bytes(nb):
        in_b = nb * 2 * h_pad * w_pad * 4
        out_b = nb * 1 * h_pad * w_pad * x.dtype.itemsize
        return 2 * (in_b + out_b) + scratch_bytes

    # Cap the per-step batch block so the unrolled group loop stays bounded
    # (<= 8 packed row groups per step -> bounded code size / vreg pressure).
    nb_conv = _pick_block(N, _conv_bytes, budget, max_block=8 * PPR)
    ngrp = -(-nb_conv // PPR)

    conv_kernel = functools.partial(
        _conv_kernel, NB=nb_conv, H=H, W=W, K=K, P=P, Hs=Hs, Ws=Ws,
        SLOT=SLOT, PPR=PPR, NGRP=ngrp, NACC=4)

    out = pl.pallas_call(
        conv_kernel,
        out_shape=jax.ShapeDtypeStruct((N, 1, H, W), x.dtype),
        grid=(N // nb_conv,),
        in_specs=[
            pl.BlockSpec(memory_space=pltpu.MemorySpace.SMEM),        # weights
            pl.BlockSpec((nb_conv, 2, H, W), lambda i: (i, 0, 0, 0)),  # planes
        ],
        out_specs=pl.BlockSpec((nb_conv, 1, H, W), lambda i: (i, 0, 0, 0)),
        scratch_shapes=[pltpu.VMEM((K, 2, Hs, Ws), jnp.float32)],
        compiler_params=pltpu.CompilerParams(
            dimension_semantics=("parallel",),
            vmem_limit_bytes=_vmem_limit(_conv_bytes(nb_conv))),
    )(w_flat, red.reshape(N, 2, H, W))

    return out


if __name__ == "__main__":
    key = jax.random.PRNGKey(0)
    k_x, k_w = jax.random.split(key)

    N, C, H, W = 2, 4, 16, 16
    K = 7

    x = jax.random.normal(k_x, (N, C, H, W), dtype=jnp.float32)

    # nn.Conv2d(2, 1, 7, padding=3, bias=False)-style weight.
    fan_in = 2 * K * K
    bound = 1.0 / (fan_in ** 0.5)
    conv_weight = jax.random.uniform(
        k_w, (1, 2, K, K), jnp.float32, minval=-bound, maxval=bound)

    out = spatial_attention(x, conv_weight)
    out = jax.block_until_ready(out)
    assert out.shape == (N, 1, H, W)
    assert out.dtype == x.dtype

    # Pure-JAX reference (same math as the PyTorch module).
    avg = jnp.mean(x, axis=1, keepdims=True)
    mx = jnp.max(x, axis=1, keepdims=True)
    pre = jax.lax.conv_general_dilated(
        jnp.concatenate([avg, mx], axis=1), conv_weight,
        window_strides=(1, 1), padding=((K // 2, K // 2), (K // 2, K // 2)),
        dimension_numbers=("NCHW", "OIHW", "NCHW"))
    ref = jax.nn.sigmoid(pre)
    max_err = float(jnp.max(jnp.abs(out - ref)))
    assert max_err < 1e-5, f"max abs error vs reference: {max_err}"

    print("KERNEL_OK")
</pallas_src>

<mosaic_0001>
module attributes {stable_mosaic.version = 11 : i64} {
  func.func @_reduce_kernel(%arg0: i32, %arg1: memref<1x4x256xf32, #tpu.memory_space<vmem>>, %arg2: memref<1x2x256xf32, #tpu.memory_space<vmem>>) attributes {dimension_semantics = [#tpu.dimension_semantics<parallel>], iteration_bounds = array<i64: 2>, scalar_prefetch = 0 : i64, scratch_operands = 0 : i64, tpu.core_type = #tpu.core_type<tc>, window_params = [{transform_indices = @transform_0, window_bounds = array<i64: 1, 4, 256>}, {transform_indices = @transform_1, window_bounds = array<i64: 1, 2, 256>}]} {
    %c0 = arith.constant 0 : index
    %c0_0 = arith.constant 0 : index
    %c0_1 = arith.constant 0 : index
    %0 = vector.load %arg1[%c0, %c0_0, %c0_1] : memref<1x4x256xf32, #tpu.memory_space<vmem>>, vector<1x1x256xf32>
    %1 = vector.shape_cast %0 : vector<1x1x256xf32> to vector<1x256xf32>
    %c0_2 = arith.constant 0 : index
    %c1 = arith.constant 1 : index
    %c0_3 = arith.constant 0 : index
    %2 = vector.load %arg1[%c0_2, %c1, %c0_3] : memref<1x4x256xf32, #tpu.memory_space<vmem>>, vector<1x1x256xf32>
    %3 = vector.shape_cast %2 : vector<1x1x256xf32> to vector<1x256xf32>
    %c0_4 = arith.constant 0 : index
    %c2 = arith.constant 2 : index
    %c0_5 = arith.constant 0 : index
    %4 = vector.load %arg1[%c0_4, %c2, %c0_5] : memref<1x4x256xf32, #tpu.memory_space<vmem>>, vector<1x1x256xf32>
    %5 = vector.shape_cast %4 : vector<1x1x256xf32> to vector<1x256xf32>
    %c0_6 = arith.constant 0 : index
    %c3 = arith.constant 3 : index
    %c0_7 = arith.constant 0 : index
    %6 = vector.load %arg1[%c0_6, %c3, %c0_7] : memref<1x4x256xf32, #tpu.memory_space<vmem>>, vector<1x1x256xf32>
    %7 = vector.shape_cast %6 : vector<1x1x256xf32> to vector<1x256xf32>
    %c0_8 = arith.constant 0 : index
    %c0_9 = arith.constant 0 : index
    %c0_10 = arith.constant 0 : index
    %8 = vector.load %arg1[%c0_8, %c0_9, %c0_10] : memref<1x4x256xf32, #tpu.memory_space<vmem>>, vector<1x1x256xf32>
    %9 = vector.shape_cast %8 : vector<1x1x256xf32> to vector<1x256xf32>
    %c0_11 = arith.constant 0 : index
    %c1_12 = arith.constant 1 : index
    %c0_13 = arith.constant 0 : index
    %10 = vector.load %arg1[%c0_11, %c1_12, %c0_13] : memref<1x4x256xf32, #tpu.memory_space<vmem>>, vector<1x1x256xf32>
    %11 = vector.shape_cast %10 : vector<1x1x256xf32> to vector<1x256xf32>
    %c0_14 = arith.constant 0 : index
    %c2_15 = arith.constant 2 : index
    %c0_16 = arith.constant 0 : index
    %12 = vector.load %arg1[%c0_14, %c2_15, %c0_16] : memref<1x4x256xf32, #tpu.memory_space<vmem>>, vector<1x1x256xf32>
    %13 = vector.shape_cast %12 : vector<1x1x256xf32> to vector<1x256xf32>
    %c0_17 = arith.constant 0 : index
    %c3_18 = arith.constant 3 : index
    %c0_19 = arith.constant 0 : index
    %14 = vector.load %arg1[%c0_17, %c3_18, %c0_19] : memref<1x4x256xf32, #tpu.memory_space<vmem>>, vector<1x1x256xf32>
    %15 = vector.shape_cast %14 : vector<1x1x256xf32> to vector<1x256xf32>
    %16 = arith.addf %1, %3 : vector<1x256xf32>
    %17 = arith.addf %5, %7 : vector<1x256xf32>
    %18 = arith.addf %16, %17 : vector<1x256xf32>
    %19 = arith.maximumf %9, %11 : vector<1x256xf32>
    %20 = arith.maximumf %13, %15 : vector<1x256xf32>
    %21 = arith.maximumf %19, %20 : vector<1x256xf32>
    %c0_20 = arith.constant 0 : index
    %c0_21 = arith.constant 0 : index
    %c0_22 = arith.constant 0 : index
    %22 = vector.load %arg2[%c0_20, %c0_21, %c0_22] : memref<1x2x256xf32, #tpu.memory_space<vmem>>, vector<1x1x256xf32>
    %23 = vector.shape_cast %22 : vector<1x1x256xf32> to vector<1x256xf32>
    %24 = vector.shape_cast %18 : vector<1x256xf32> to vector<1x1x256xf32>
    tpu.vector_store %arg2[%c0_20, %c0_21, %c0_22], %24 {strides = array<i32>} : memref<1x2x256xf32, #tpu.memory_space<vmem>>, vector<1x1x256xf32>,
    %c0_23 = arith.constant 0 : index
    %c1_24 = arith.constant 1 : index
    %c0_25 = arith.constant 0 : index
    %25 = vector.load %arg2[%c0_23, %c1_24, %c0_25] : memref<1x2x256xf32, #tpu.memory_space<vmem>>, vector<1x1x256xf32>
    %26 = vector.shape_cast %25 : vector<1x1x256xf32> to vector<1x256xf32>
    %27 = vector.shape_cast %21 : vector<1x256xf32> to vector<1x1x256xf32>
    tpu.vector_store %arg2[%c0_23, %c1_24, %c0_25], %27 {strides = array<i32>} : memref<1x2x256xf32, #tpu.memory_space<vmem>>, vector<1x1x256xf32>,
    return
  }
  func.func @transform_0(%arg0: i32) -> (i32, i32, i32) {
    %c0_i32 = arith.constant 0 : i32
    %c0_i32_0 = arith.constant 0 : i32
    %c0_i32_1 = arith.constant 0 : i32
    return %arg0, %c0_i32, %c0_i32_0 : i32, i32, i32
  }
  func.func @transform_1(%arg0: i32) -> (i32, i32, i32) {
    %c0_i32 = arith.constant 0 : i32
    %c0_i32_0 = arith.constant 0 : i32
    %c0_i32_1 = arith.constant 0 : i32
    return %arg0, %c0_i32, %c0_i32_0 : i32, i32, i32
  }
}

</mosaic_0001>

<bundles_post_ra>
// kernel: tpu_custom_call.1
= control target key start
LH: loop header
LB: loop body
LE: loop exit
PB: predicated region body
PF: predicated region fallthrough
CT: control target
= control target key end

     0   :  { %6 = vsyncpa [#allocation3], 0  ;;  %s558_s0 = inlined_call_operand.hbm [shape: f32[2,4,256], index: 0, kind: input, shape index: {}]   ;;  %s559_s1 = inlined_call_operand.hbm [shape: f32[2,2,256], index: 1, kind: output, shape index: {}]  }
   0x1   :  { %8 = vsyncpa [#allocation3 + $0x1], 0 }
   0x2   :  { %9 = vsyncpa [#allocation4], 0 }
   0x3   :  { %11 = vsyncpa [#allocation4 + $0x1], 0  ;;  %s410_s6 = smov 0   ;;  %s412_s7 = smov 0  }
   0x4   :  { %s414_s8 = smov 0   ;;  %s416_s9 = smov 0  }
   0x5 LB: > { %s431_s10 = sadd.s32 4294967295, %s396_s9   ;;  %s238_s11 = sadd.s32 4294967294, %s396_s9   ;;  %s396_s9 = sphi %s416_s9, %s576_s9   ;;  %s392_s8 = sphi %s414_s8, %s575_s8   ;;  %s388_s7 = sphi %s412_s7, %s574_s7   ;;  %s384_s6 = sphi %s410_s6, %s573_s6  }
   0x6   : > { %s435_s12 = sadd.s32 1, %s396_s9   ;;  %s24_s13 = sadd.s32 1, %s392_s8 }
   0x7   : > { %s21_s14 = ssub.s32 %s396_s9, %s435_s12  ;;  %p31_p0 = scmp.ne.s32.totalorder %s392_s8, %s388_s7 }
   0x8   : > { %p22_p1 = scmp.eq.s32.totalorder %s21_s14, 0  ;;  %p32_p2 = scmp.eq.s32.totalorder %s396_s9, 0 }
   0x9   : > { %p37_p3 = scmp.ne.s32.totalorder %s388_s7, %s384_s6  ;;  %p38_p4 = scmp.eq.s32.totalorder %s431_s10, 0 }
   0xa   : > { %s447_s15 = scalar_select %p22_p1, %s392_s8, %s24_s13  }
   0xb   : > { %p449_p5 = por %p32_p2, %p31_p0  ;;  %p453_p6 = por %p38_p4, %p37_p3 }
   0xc   : > { %p61_p7 = scmp.eq.s32.totalorder %s431_s10, 1  ;;  %p67_p8 = scmp.eq.s32.totalorder %s238_s11, 1 }
   0xd   : > { %s563_s17 = scalar_select %p453_p6, 1, 0 }
   0xe   : > { %p270_p10 = scmp.lt.s32.totalorder %s396_s9, 2  ;;  %p460_p11 = por %p61_p7, %p31_p0 }
   0xf   : > { %p464_p12 = por %p67_p8, %p37_p3  ;;  %s87_s20 = sand.u32 1, %s392_s8  }
  0x10   : > { %s564_s18 = scalar_select %p460_p11, 1, 0 }
  0x11   : > { %s565_s19 = scalar_select %p464_p12, 1, 0 }
  0x12   : > { %s256_s21 = sshll.u32 %s396_s9, 7  ;;  %s241_s22 = sshll.u32 %s87_s20, 3 }
  0x13   : > { %s473_s25 = scalar_lea.hbm %s558_s0, %s256_s21  ;;  %s91_s26 = scalar_lea.vmem [#allocation2], %s241_s22 }
  0x14   : > { %s99_s27 = sshll.u32 %s91_s26, 4  ;;  %p477_p13 = pnand %p270_p10, %p449_p5  ;;  %s481_s27 = int_to_ptr.vmem [resolvable:$true] %s99_s27 }
  0x15   : > { %s88_s29 = scalar_lea.sflag [#allocation3], %s87_s20  ;;  %s304_s30 = scalar_lea.hbm %s473_s25, 128 }
  0x16   : > { %p305_p2 = scmp.ne.s32.totalorder %s473_s25, %s304_s30  ;;  %p306_p3 = pneg %p477_p13 }
  0x17   : > { %s309_s4 = scalar_lea.hbm %s558_s0, 256  ;;  %p310_p5 = scmp.lt.s32.totalorder %s473_s25, %s558_s0 }
  0x18   : > { %p307_p4 = pnand %p306_p3, %p305_p2  ;;  %p311_p8 = scmp.lt.s32.totalorder %s309_s4, %s304_s30 }
  0x1a   : > { %p308_p7 = pneg %p307_p4  ;;  %p312_p10 = por %p311_p8, %p310_p5 }
  0x1c   : > { %p313_p9 = pnand %p312_p10, %p308_p7 }
  0x1e   : > { %316 = shalt.err (!%p313_p9)
}
  0x1f   : > { %s317_s13 = scalar_lea.vmem %s481_s27, 128  ;;  %s398_s14 = smov [#allocation2]  }
  0x20   : > { %p318_p0 = scmp.ne.s32.totalorder %s481_s27, %s317_s13  ;;  %s322_s16 = sshll.u32 %s398_s14, 4  ;;  %s323_s16 = int_to_ptr.vmem [resolvable:$false] %s322_s16 }
  0x21   : > { %s324_s20 = scalar_lea.vmem %s323_s16, 256  ;;  %p325_p4 = scmp.lt.s32.totalorder %s481_s27, %s323_s16 }
  0x22   : > { %p320_p1 = pnand %p318_p0, %p306_p3  ;;  %p326_p12 = scmp.lt.s32.totalorder %s324_s20, %s317_s13 }
  0x24   : > { %p321_p2 = pneg %p320_p1  ;;  %p327_p11 = por %p326_p12, %p325_p4 }
  0x26   : > { %p328_p6 = pnand %p327_p11, %p321_p2 }
  0x28   : > { %331 = shalt.err (!%p328_p6)
}
  0x29   : > { %265 = dma.hbm_to_vmem [thread:$0]  (!%p477_p13), %s473_s25, 128, %s481_s27, %s88_s29  }
  0x2a   : > { %p567_p9 = scmp.lt.s32.totalorder %s396_s9, 3  ;;  %p568_p7 = scmp.ge.s32.totalorder %s396_s9, 1 }
  0x2c   : > { %p105_p0 = pnand %p568_p7, %p567_p9 }
  0x2d   : > { %s508_s21 = sand.u32 (!%p105_p0), 1, %s388_s7   ;;  %p569_p6 = scmp.ne.s32.totalorder (!%p105_p0), %s563_s17, 0 }
  0x2e   : > { %108 = sbr.rel (%p105_p0) target bundleno = 77 (0x4d), region = 24  ;;  %s245_s22 = sshll.u32 (!%p105_p0), %s508_s21, 3 }
  0x2f   : > { %s111_s23 = scalar_lea.sflag (!%p105_p0), [#allocation3], %s508_s21  ;;  %s114_s24 = scalar_lea.vmem (!%p105_p0), [#allocation2], %s245_s22 }
  0x33   : > { %375 = dma.done.wait (%p569_p6), %s111_s23, 128  }
  0x34   : > { %377 = vsyncadd (%p569_p6), %s111_s23, 4294967168  ;;  %s246_s25 = sshll.u32 %s508_s21, 2  ;;  %v146_v0 = vlaneseq  ;;  %s257_s28 = sshll.u32 %s431_s10, 6  ;;  %v133_v1 = vld [vmem:[%s114_s24] ss:$4 sm:$0x3] }
  0x35   : > { %s132_s26 = scalar_lea.vmem [#allocation5], %s246_s25  ;;  %v247_v2 = vld [vmem:[%s114_s24 + $0x1] ss:$4 sm:$0x3]  ;;  %s166_s29 = scalar_lea.hbm %s559_s1, %s257_s28 }
  0x36   : > { %s168_s27 = sshll.u32 %s132_s26, 4  ;;  %v248_v3 = vld [vmem:[%s114_s24 + $0x2] ss:$4 sm:$0x3]  ;;  %v140_v5 = vadd.f32 %v247_v2, %v133_v1  ;;  %v143_v6 = vmax.f32 %v133_v1, %v247_v2  ;;  %vm148_vm0 = vcmp.lt.s32.totalorder %v146_v0, 256  ;;  %s154_s30 = scalar_lea.sflag [#allocation4], %s508_s21  ;;  %s518_s27 = int_to_ptr.vmem [resolvable:$true] %s168_s27 }
  0x37   : > { %v249_v4 = vld [vmem:[%s114_s24 + $0x3] ss:$4 sm:$0x3]  ;;  %s332_s2 = scalar_lea.vmem %s518_s27, 64  ;;  %p570_p12 = scmp.ne.s32.totalorder %s564_s18, 0 }
  0x38   : > { %v141_v7 = vadd.f32 %v249_v4, %v248_v3  ;;  %v144_v8 = vmax.f32 %v248_v3, %v249_v4  ;;  %p333_p11 = scmp.ne.s32.totalorder %s518_s27, %s332_s2  ;;  %s399_s3 = smov [#allocation5]  }
  0x39   : > { %s336_s4 = sshll.u32 %s399_s3, 4  ;;  %s337_s4 = int_to_ptr.vmem [resolvable:$false] %s336_s4 }
  0x3a   : > { %v142_v9 = vadd.f32 %v141_v7, %v140_v5  ;;  %v145_v10 = vmax.f32 %v143_v6, %v144_v8  ;;  %p334_p13 = pnand %p333_p11, %p570_p12  ;;  %s338_s5 = scalar_lea.vmem %s337_s4, 128 }
  0x3b   : > { %p339_p3 = scmp.lt.s32.totalorder %s518_s27, %s337_s4  ;;  %p340_p5 = scmp.lt.s32.totalorder %s338_s5, %s332_s2 }
  0x3c   : > { %150 = vst.msk [vmem:[%s132_s26] ss:$2 sm:$0x3] %vm148_vm0, %v142_v9  ;;  %250 = vst.msk [vmem:[%s132_s26 + $0x1] ss:$2 sm:$0x3] %vm148_vm0, %v145_v10  ;;  %p335_p1 = pneg %p334_p13 }
  0x3d   : > { %p341_p8 = por %p340_p5, %p339_p3 }
  0x3f   : > { %p342_p10 = pnand %p341_p8, %p335_p1 }
  0x41   : > { %345 = shalt.err (!%p342_p10)
}
  0x42   : > { %s346_s11 = scalar_lea.hbm %s166_s29, 64  ;;  %s350_s16 = scalar_lea.hbm %s559_s1, 128 }
  0x43   : > { %p347_p2 = scmp.ne.s32.totalorder %s166_s29, %s346_s11  ;;  %p351_p7 = scmp.lt.s32.totalorder %s166_s29, %s559_s1 }
  0x44   : > { %p352_p0 = scmp.lt.s32.totalorder %s350_s16, %s346_s11 }
  0x45   : > { %p348_p4 = pnand %p347_p2, %p570_p12 }
  0x46   : > { %p353_p6 = por %p352_p0, %p351_p7 }
  0x47   : > { %p349_p9 = pneg %p348_p4 }
  0x49   : > { %p354_p11 = pnand %p353_p6, %p349_p9 }
  0x4b   : > { %357 = shalt.err (!%p354_p11)
}
  0x4c   : > { %260 = dma.vmem_to_hbm [thread:$0]  (%p570_p12), %s518_s27, 64, %s166_s29, %s154_s30  }
  0x4d PF: > { %s180_s22 = sand.u32 1, %s384_s6   ;;  %p571_p13 = scmp.ne.s32.totalorder %s565_s19, 0 }
  0x4e   : > { %p572_p1 = scmp.ge.s32.totalorder %s396_s9, 2  ;;  %s181_s23 = scalar_lea.sflag [#allocation4], %s180_s22 }
  0x50   : > { %p267_p3 = pnand %p572_p1, %p571_p13 }
  0x52   : > { %p268_p5 = pneg %p267_p3 }
  0x54   : > { %379 = dma.done.wait (%p268_p5), %s181_s23, 64  }
  0x55   : > { %381 = vsyncadd (%p268_p5), %s181_s23, 4294967232  ;;  %p14_p8 = scmp.ge.s32.totalorder %s435_s12, 4   ;;  %s573_s6 = smov %s388_s7 }
  0x56   : > { %s574_s7 = smov %s392_s8  ;;  %s575_s8 = smov %s447_s15 }
  0x57   : > { %s576_s9 = smov %s435_s12  ;;  %16 = sbr.rel (!%p14_p8) target bundleno = 5 (0x5), region = 73 }
  0x5c   :  { %186 = vsyncpa [#allocation3], 1 }
  0x5d   :  { %188 = vsyncpa [#allocation3 + $0x1], 1 }
  0x5e   :  { %189 = vsyncpa [#allocation4], 1 }
  0x5f   :  { %191 = vsyncpa [#allocation4 + $0x1], 1 }

</bundles_post_ra>
